<compile_context>
chip_gen: v7x
topology: tpu7x:2x2x1
jax: 0.10.0
libtpu: 0.0.40
codegen_flags: <defaults>
</compile_context>

<pallas_src>
import math

import jax
import jax.numpy as jnp
from jax.experimental import pallas as pl
from jax.experimental.pallas import tpu as pltpu

_LANES = 128
_TILE_BYTES_TARGET = 4 * 1024 * 1024   # per x/out block; 4 MiB is in the sweet spot for v5e/v6e/v7x
_VMEM_LIMIT_BYTES = 48 * 1024 * 1024   # worst case usage <= ~32 MiB (x+out+slabs, double-buffered)
_MAX_BATCH_FOLD = 8                     # cap on the static unroll over folded batch elements


def _cdiv(a: int, b: int) -> int:
    return -(-a // b)


def _lcm(a: int, b: int) -> int:
    return a * b // math.gcd(a, b)


def _largest_fold(batch: int, unit_bytes: int, budget: int) -> int:
    """Largest divisor of `batch` (<= _MAX_BATCH_FOLD) whose folded block fits `budget`."""
    for cand in range(min(batch, _MAX_BATCH_FOLD), 0, -1):
        if batch % cand == 0 and cand * unit_bytes <= budget:
            return cand
    return 1


def _time_embed_kernel(lt_ref, x_ref, w_ref, b_ref, o_ref):
    """Unified kernel for both the lane-dense (flat) and row-major paths.

    lt_ref: SMEM scalar-prefetch, (B,) float32
    x_ref : VMEM (Bt, S, P, 128)  or (Bt, TL, E), x.dtype
    w_ref : VMEM (P, 128)         or (1, E), float32 (grid-invariant slab)
    b_ref : same shape as w_ref, float32
    o_ref : same shape as x_ref, x.dtype
    """
    bt = x_ref.shape[0]
    b0 = pl.program_id(0) * bt
    w = w_ref[...]
    b = b_ref[...]
    for i in range(bt):                       # static unroll, bt <= _MAX_BATCH_FOLD
        t = lt_ref[b0 + i]                    # per-batch scalar lead time from SMEM
        emb = t * w + b                       # small f32 FMA (VPU) -- free under the DMA roofline
        o_ref[i] = (x_ref[i] + emb).astype(o_ref.dtype)   # trailing-dim broadcast add


def _flat_plan(B, L, E, itemsize, tile_bytes_target):
    """Plan the lane-dense path. Returns (R, P, S_total, S, n_tiles, Bt) or None."""
    F = L * E
    if F % _LANES != 0:
        return None
    R = F // _LANES                                    # 128-lane rows per batch element
    pack = max(8, 32 // itemsize)                      # sublane packing: 8 f32, 16 bf16, 32 int8
    p0 = E // math.gcd(E, _LANES)                      # emb repeat period (rows); divides R
    base = _lcm(p0, pack)                              # keep slab splits tile-aligned
    P = base if R % base == 0 else R                   # slab rows; (P*128) % E == 0 in both cases
    if P * _LANES * 4 > tile_bytes_target:             # keep the f32 w/b slabs small
        return None
    S_total = R // P
    max_rows = max(1, tile_bytes_target // (_LANES * itemsize))
    S = max(1, min(S_total, max_rows // P))            # period-groups per tile
    n_tiles = _cdiv(S_total, S)                        # cdiv grid; ragged tail is masked
    tile_bytes = S * P * _LANES * itemsize
    Bt = _largest_fold(B, tile_bytes, tile_bytes_target)
    return R, P, S_total, S, n_tiles, Bt


def time_embed(x, lead_times, weight, bias, *, tile_bytes_target=_TILE_BYTES_TARGET):
    """Pallas TimeEmbed forward.

    x:          (B, L, E)  patch tokens
    lead_times: (B,)       forecast lead times
    weight:     (E, 1)     torch nn.Linear(1, E).weight layout
    bias:       (E,)       torch nn.Linear(1, E).bias layout
    """
    B, L, E = x.shape
    lt = lead_times.reshape(-1).astype(jnp.float32)
    w_flat = weight.reshape(-1).astype(jnp.float32)    # (E,)
    b_flat = bias.reshape(-1).astype(jnp.float32)      # (E,)
    itemsize = jnp.dtype(x.dtype).itemsize

    cost = pl.CostEstimate(
        flops=int(B * L * E + 2 * B * E),
        transcendentals=0,
        bytes_accessed=int(2 * B * L * E * itemsize + (B + 2 * E) * 4),
    )
    cparams = pltpu.CompilerParams(
        dimension_semantics=("parallel", "parallel"),
        vmem_limit_bytes=_VMEM_LIMIT_BYTES,
    )

    plan = _flat_plan(B, L, E, itemsize, tile_bytes_target)
    if plan is not None:
        R, P, S_total, S, n_tiles, Bt = plan
        # Minimal period-sized slabs: emb pattern repeats every P rows of the flat view.
        reps = (P * _LANES) // E
        w_slab = jnp.tile(w_flat, reps).reshape(P, _LANES)
        b_slab = jnp.tile(b_flat, reps).reshape(P, _LANES)
        x_view = x.reshape(B, S_total, P, _LANES)       # contiguous: free bitcast reshape

        grid_spec = pltpu.PrefetchScalarGridSpec(
            num_scalar_prefetch=1,                      # lead_times -> SMEM
            grid=(B // Bt, n_tiles),
            in_specs=[
                pl.BlockSpec((Bt, S, P, _LANES), lambda b, s, lt: (b, s, 0, 0)),  # x tile
                pl.BlockSpec((P, _LANES), lambda b, s, lt: (0, 0)),               # weight slab
                pl.BlockSpec((P, _LANES), lambda b, s, lt: (0, 0)),               # bias slab
            ],
            out_specs=pl.BlockSpec((Bt, S, P, _LANES), lambda b, s, lt: (b, s, 0, 0)),
        )
        out = pl.pallas_call(
            _time_embed_kernel,
            out_shape=jax.ShapeDtypeStruct((B, S_total, P, _LANES), x.dtype),
            grid_spec=grid_spec,
            compiler_params=cparams,
            cost_estimate=cost,
        )(lt, x_view, w_slab, b_slab)
        return out.reshape(B, L, E)

    # Fallback: L*E not a multiple of 128 (or degenerate period). Row-major (Bt, TL, E)
    # blocks tiled along L so large shapes never map one giant block per batch element.
    row_bytes = E * itemsize
    if L * row_bytes <= tile_bytes_target or L < 8:
        TL = L                                          # single (legal full-dim) row block
    else:
        TL = max(8, (tile_bytes_target // max(1, row_bytes)) // 8 * 8)
        TL = min(TL, L)
    ntL = _cdiv(L, TL)
    Bt = _largest_fold(B, TL * row_bytes, tile_bytes_target)
    w2d = w_flat.reshape(1, E)
    b2d = b_flat.reshape(1, E)

    grid_spec = pltpu.PrefetchScalarGridSpec(
        num_scalar_prefetch=1,
        grid=(B // Bt, ntL),
        in_specs=[
            pl.BlockSpec((Bt, TL, E), lambda b, s, lt: (b, s, 0)),
            pl.BlockSpec((1, E), lambda b, s, lt: (0, 0)),
            pl.BlockSpec((1, E), lambda b, s, lt: (0, 0)),
        ],
        out_specs=pl.BlockSpec((Bt, TL, E), lambda b, s, lt: (b, s, 0)),
    )
    return pl.pallas_call(
        _time_embed_kernel,
        out_shape=jax.ShapeDtypeStruct((B, L, E), x.dtype),
        grid_spec=grid_spec,
        compiler_params=cparams,
        cost_estimate=cost,
    )(lt, x, w2d, b2d)


def _reference(x, lead_times, weight, bias):
    emb = lead_times[:, None] * weight[:, 0][None, :] + bias[None, :]   # (B, E)
    return x + emb[:, None, :]


if __name__ == "__main__":
    root = jax.random.PRNGKey(0)

    def run_case(B, L, E, dtype, tile_bytes=None, tol=1e-5):
        kx, kl, kw, kb = jax.random.split(jax.random.fold_in(root, B * 100000 + L * 100 + E), 4)
        x32 = jax.random.normal(kx, (B, L, E), dtype=jnp.float32)
        lead_times = jax.random.uniform(kl, (B,), dtype=jnp.float32)
        weight = jax.random.normal(kw, (E, 1), dtype=jnp.float32) * 0.5
        bias = jax.random.normal(kb, (E,), dtype=jnp.float32) * 0.1
        x_in = x32.astype(dtype)
        kwargs = {} if tile_bytes is None else {"tile_bytes_target": tile_bytes}
        out = jax.block_until_ready(time_embed(x_in, lead_times, weight, bias, **kwargs))
        ref = _reference(x_in.astype(jnp.float32), lead_times, weight, bias)
        assert out.shape == (B, L, E) and out.dtype == dtype
        assert jnp.allclose(out.astype(jnp.float32), ref, atol=tol, rtol=tol), (B, L, E, str(dtype))

    # Lane-dense flat path (E % 128 != 0 but L*E % 128 == 0) with batch folding.
    run_case(2, 8, 32, jnp.float32)
    # Same path, bf16 store dtype.
    run_case(2, 8, 32, jnp.bfloat16, tol=2e-2)
    # E a multiple of 128: period slab P < R, fully lane-dense.
    run_case(2, 16, 128, jnp.float32)
    # Fallback row-major path (L*E % 128 != 0), with batch folding.
    run_case(2, 5, 24, jnp.float32)
    # Multi-tile row grid with a ragged (masked) last tile, via a tiny tile budget.
    run_case(2, 40, 256, jnp.float32, tile_bytes=12 * 1024)

    print("KERNEL_OK")
</pallas_src>

<mosaic_0001>
module attributes {stable_mosaic.version = 11 : i64} {
  func.func @_time_embed_kernel(%arg0: i32, %arg1: i32, %arg2: memref<2xf32, #tpu.memory_space<smem>>, %arg3: memref<2x1x2x128xf32, #tpu.memory_space<vmem>>, %arg4: memref<2x128xf32, #tpu.memory_space<vmem>>, %arg5: memref<2x128xf32, #tpu.memory_space<vmem>>, %arg6: memref<2x1x2x128xf32, #tpu.memory_space<vmem>>) attributes {dimension_semantics = [#tpu.dimension_semantics<parallel>, #tpu.dimension_semantics<parallel>], iteration_bounds = array<i64: 1, 1>, scalar_prefetch = 1 : i64, scratch_operands = 0 : i64, tpu.core_type = #tpu.core_type<tc>, window_params = [{transform_indices = @transform_0, window_bounds = array<i64: 2, 1, 2, 128>}, {pipeline_mode = #tpu.pipeline_mode<synchronous>, transform_indices = @transform_1, window_bounds = array<i64: 2, 128>}, {pipeline_mode = #tpu.pipeline_mode<synchronous>, transform_indices = @transform_2, window_bounds = array<i64: 2, 128>}, {transform_indices = @transform_3, window_bounds = array<i64: 2, 1, 2, 128>}]} {
    %c2_i32 = arith.constant 2 : i32
    %0 = arith.muli %arg0, %c2_i32 : i32
    %c0 = arith.constant 0 : index
    %c0_0 = arith.constant 0 : index
    %1 = vector.load %arg4[%c0, %c0_0] : memref<2x128xf32, #tpu.memory_space<vmem>>, vector<2x128xf32>
    %c0_1 = arith.constant 0 : index
    %c0_2 = arith.constant 0 : index
    %2 = vector.load %arg5[%c0_1, %c0_2] : memref<2x128xf32, #tpu.memory_space<vmem>>, vector<2x128xf32>
    %c0_i32 = arith.constant 0 : i32
    %3 = arith.addi %0, %c0_i32 : i32
    %4 = arith.index_cast %3 : i32 to index
    %5 = memref.load %arg2[%4] : memref<2xf32, #tpu.memory_space<smem>>
    %6 = vector.broadcast %5 : f32 to vector<2x128xf32>
    %7 = arith.mulf %6, %1 : vector<2x128xf32>
    %8 = arith.addf %7, %2 : vector<2x128xf32>
    %c0_3 = arith.constant 0 : index
    %c0_4 = arith.constant 0 : index
    %c0_5 = arith.constant 0 : index
    %c0_6 = arith.constant 0 : index
    %9 = vector.load %arg3[%c0_3, %c0_4, %c0_5, %c0_6] : memref<2x1x2x128xf32, #tpu.memory_space<vmem>>, vector<1x1x2x128xf32>
    %10 = vector.shape_cast %9 : vector<1x1x2x128xf32> to vector<1x2x128xf32>
    %11 = vector.shape_cast %8 : vector<2x128xf32> to vector<1x2x128xf32>
    %12 = arith.addf %10, %11 : vector<1x2x128xf32>
    %c0_7 = arith.constant 0 : index
    %c0_8 = arith.constant 0 : index
    %c0_9 = arith.constant 0 : index
    %c0_10 = arith.constant 0 : index
    %13 = vector.load %arg6[%c0_7, %c0_8, %c0_9, %c0_10] : memref<2x1x2x128xf32, #tpu.memory_space<vmem>>, vector<1x1x2x128xf32>
    %14 = vector.shape_cast %13 : vector<1x1x2x128xf32> to vector<1x2x128xf32>
    %15 = vector.shape_cast %12 : vector<1x2x128xf32> to vector<1x1x2x128xf32>
    tpu.vector_store %arg6[%c0_7, %c0_8, %c0_9, %c0_10], %15 {strides = array<i32>} : memref<2x1x2x128xf32, #tpu.memory_space<vmem>>, vector<1x1x2x128xf32>,
    %c1_i32 = arith.constant 1 : i32
    %16 = arith.addi %0, %c1_i32 : i32
    %17 = arith.index_cast %16 : i32 to index
    %18 = memref.load %arg2[%17] : memref<2xf32, #tpu.memory_space<smem>>
    %19 = vector.broadcast %18 : f32 to vector<2x128xf32>
    %20 = arith.mulf %19, %1 : vector<2x128xf32>
    %21 = arith.addf %20, %2 : vector<2x128xf32>
    %c1 = arith.constant 1 : index
    %c0_11 = arith.constant 0 : index
    %c0_12 = arith.constant 0 : index
    %c0_13 = arith.constant 0 : index
    %22 = vector.load %arg3[%c1, %c0_11, %c0_12, %c0_13] : memref<2x1x2x128xf32, #tpu.memory_space<vmem>>, vector<1x1x2x128xf32>
    %23 = vector.shape_cast %22 : vector<1x1x2x128xf32> to vector<1x2x128xf32>
    %24 = vector.shape_cast %21 : vector<2x128xf32> to vector<1x2x128xf32>
    %25 = arith.addf %23, %24 : vector<1x2x128xf32>
    %c1_14 = arith.constant 1 : index
    %c0_15 = arith.constant 0 : index
    %c0_16 = arith.constant 0 : index
    %c0_17 = arith.constant 0 : index
    %26 = vector.load %arg6[%c1_14, %c0_15, %c0_16, %c0_17] : memref<2x1x2x128xf32, #tpu.memory_space<vmem>>, vector<1x1x2x128xf32>
    %27 = vector.shape_cast %26 : vector<1x1x2x128xf32> to vector<1x2x128xf32>
    %28 = vector.shape_cast %25 : vector<1x2x128xf32> to vector<1x1x2x128xf32>
    tpu.vector_store %arg6[%c1_14, %c0_15, %c0_16, %c0_17], %28 {strides = array<i32>} : memref<2x1x2x128xf32, #tpu.memory_space<vmem>>, vector<1x1x2x128xf32>,
    return
  }
  func.func @transform_0(%arg0: i32, %arg1: i32, %arg2: memref<2xf32, #tpu.memory_space<smem>>) -> (i32, i32, i32, i32) {
    %c0_i32 = arith.constant 0 : i32
    %c0_i32_0 = arith.constant 0 : i32
    %c0_i32_1 = arith.constant 0 : i32
    return %arg0, %arg1, %c0_i32, %c0_i32_0 : i32, i32, i32, i32
  }
  func.func @transform_1(%arg0: i32, %arg1: i32, %arg2: memref<2xf32, #tpu.memory_space<smem>>) -> (i32, i32) {
    %c0_i32 = arith.constant 0 : i32
    %c0_i32_0 = arith.constant 0 : i32
    %c0_i32_1 = arith.constant 0 : i32
    return %c0_i32, %c0_i32_0 : i32, i32
  }
  func.func @transform_2(%arg0: i32, %arg1: i32, %arg2: memref<2xf32, #tpu.memory_space<smem>>) -> (i32, i32) {
    %c0_i32 = arith.constant 0 : i32
    %c0_i32_0 = arith.constant 0 : i32
    %c0_i32_1 = arith.constant 0 : i32
    return %c0_i32, %c0_i32_0 : i32, i32
  }
  func.func @transform_3(%arg0: i32, %arg1: i32, %arg2: memref<2xf32, #tpu.memory_space<smem>>) -> (i32, i32, i32, i32) {
    %c0_i32 = arith.constant 0 : i32
    %c0_i32_0 = arith.constant 0 : i32
    %c0_i32_1 = arith.constant 0 : i32
    return %arg0, %arg1, %c0_i32, %c0_i32_0 : i32, i32, i32, i32
  }
}

</mosaic_0001>

<bundles_post_ra>
// kernel: tpu_custom_call.1
= control target key start
LH: loop header
LB: loop body
LE: loop exit
PB: predicated region body
PF: predicated region fallthrough
CT: control target
= control target key end

     0   :  { %s215_s0 = inlined_call_operand.hbm [shape: f32[2], index: 0, kind: input, shape index: {}]   ;;  %s216_s1 = inlined_call_operand.hbm [shape: f32[2,1,2,128], index: 1, kind: input, shape index: {}]   ;;  %s217_s2 = inlined_call_operand.vmem [shape: f32[2,128], index: 2, kind: input, shape index: {}]   ;;  %s218_s3 = inlined_call_operand.vmem [shape: f32[2,128], index: 3, kind: input, shape index: {}]   ;;  %s219_s4 = inlined_call_operand.hbm [shape: f32[2,1,2,128], index: 4, kind: output, shape index: {}]  }
   0x1   :  { %s77_s17 = scalar_lea.hbm %s215_s0, 16 }
   0x2   :  { %p78_p0 = scmp.ne.s32.totalorder %s215_s0, %s77_s17  ;;  %p81_p1 = scmp.lt.u32.totalorder %s77_s17, %s215_s0 }
   0x4   :  { %p83_p2 = pnand %p81_p1, %p78_p0 }
   0x6   :  { %86 = shalt.err (!%p83_p2)  }
   0x7   :  { %s137_s22 = smov [#allocation3]  }
   0x8   :  { %10 = dma.hbm_to_smem %s215_s0, 16, %s137_s22, [#allocation2] }
   0x9   :  { %131 = dma.done.wait [#allocation2], 16 }
   0xa   :  { %132 = vsyncadd [#allocation2], 4294967280 }
   0xb   :  { %12 = sfence }
   0xc   :  { %13 = vsyncpa [#allocation5], 0 }
   0xd   :  { %14 = vsyncpa [#allocation6], 0  ;;  %s138_s25 = smov [#allocation4]   ;;  %s87_s29 = scalar_lea.hbm %s216_s1, 64 }
   0xe   :  { %s20_s26 = sshll.u32 %s138_s25, 4  ;;  %p88_p3 = scmp.ne.s32.totalorder %s216_s1, %s87_s29  ;;  %s21_s26 = int_to_ptr.vmem [resolvable:$true] %s20_s26 }
   0xf   :  { %p91_p4 = scmp.lt.u32.totalorder %s87_s29, %s216_s1 }
  0x11   :  { %p93_p5 = pnand %p91_p4, %p88_p3 }
  0x13   :  { %96 = shalt.err (!%p93_p5)
}
  0x14   :  { %s97_s0 = scalar_lea.vmem %s21_s26, 64  ;;  %p102_p7 = scmp.lt.s32.totalorder %s21_s26, %s21_s26 }
  0x15   :  { %p98_p6 = scmp.ne.s32.totalorder %s21_s26, %s97_s0  ;;  %p103_p8 = scmp.lt.s32.totalorder %s97_s0, %s97_s0 }
  0x17   :  { %p104_p9 = por %p103_p8, %p102_p7 }
  0x19   :  { %p105_p10 = pnand %p104_p9, %p98_p6 }
  0x1b   :  { %108 = shalt.err (!%p105_p10)
}
  0x1c   :  { %s139_s8 = smov 32   ;;  %s140_s9 = smov 2  }
  0x1d   :  { %26 = dma.hbm_to_vmem [thread:$0]  %s216_s1, 64, %s21_s26, [#allocation5], %s139_s8, %s139_s8, %s140_s9  }
  0x1e   :  { %133 = dma.done.wait [#allocation5], 64  }
  0x1f   :  { %134 = vsyncadd [#allocation5], 4294967232  ;;  %s37_s12 = sld [smem:[#allocation3]]  ;;  %s71_s13 = sld [smem:[#allocation3 + $0x1]]  ;;  %v35_v0 = vld [vmem:[%s217_s2] sm:$0x3] }
  0x20   :  { %v36_v1 = vld [vmem:[%s218_s3] sm:$0x3]  ;;  %v41_v6 = vld [vmem:[#allocation4] sm:$0x3]  ;;  %v50_v7 = vld [vmem:[#allocation4 + $0x2] sm:$0x3] }
  0x21   :  { %s141_s18 = smov [#allocation7]  }
  0x22   :  { %s59_s1 = sshll.u32 %s141_s18, 4  ;;  %s60_s1 = int_to_ptr.vmem [resolvable:$true] %s59_s1 }
  0x23   :  { %s109_s2 = scalar_lea.vmem %s60_s1, 64  ;;  %p114_p12 = scmp.lt.s32.totalorder %s60_s1, %s60_s1 }
  0x24   :  { %p110_p11 = scmp.ne.s32.totalorder %s60_s1, %s109_s2  ;;  %p115_p13 = scmp.lt.s32.totalorder %s109_s2, %s109_s2 }
  0x25   :  { %v38_v2 = vstv %s37_s12  ;;  %v46_v3 = vstv %s71_s13 }
  0x26   :  { %v39_v4 = vmul.f32 %v38_v2, %v35_v0  ;;  %v47_v5 = vmul.f32 %v46_v3, %v35_v0  ;;  %p116_p0 = por %p115_p13, %p114_p12 }
  0x28   :  { %v40_v8 = vadd.f32 %v39_v4, %v36_v1  ;;  %v48_v9 = vadd.f32 %v47_v5, %v36_v1  ;;  %p117_p1 = pnand %p116_p0, %p110_p11 }
  0x2a   :  { %v42_v10 = vadd.f32 %v41_v6, %v40_v8  ;;  %v51_v11 = vadd.f32 %v50_v7, %v48_v9 }
  0x2c   :  { %43 = vst [vmem:[#allocation7] sm:$0x3] %v42_v10  ;;  %53 = vst [vmem:[#allocation7 + $0x2] sm:$0x3] %v51_v11 }
  0x2d   :  { %120 = shalt.err (!%p117_p1)
}
  0x2e   :  { %s121_s20 = scalar_lea.hbm %s219_s4, 64 }
  0x2f   :  { %p122_p2 = scmp.ne.s32.totalorder %s219_s4, %s121_s20  ;;  %p125_p3 = scmp.lt.u32.totalorder %s121_s20, %s219_s4 }
  0x31   :  { %p127_p4 = pnand %p125_p3, %p122_p2 }
  0x33   :  { %130 = shalt.err (!%p127_p4)
}
  0x34   :  { %65 = dma.vmem_to_hbm [thread:$0]  %s60_s1, 64, %s219_s4, [#allocation6], %s139_s8, %s139_s8, %s140_s9  }
  0x35   :  { %135 = dma.done.wait [#allocation6], 64  }
  0x36   :  { %136 = vsyncadd [#allocation6], 4294967232 }
  0x37   :  { %69 = vsyncpa [#allocation5], 1 }
  0x38   :  { %70 = vsyncpa [#allocation6], 1 }

</bundles_post_ra>
